<compile_context>
chip_gen: v5e
topology: v5e:2x2
jax: 0.10.0
libtpu: 0.0.40
codegen_flags: <defaults>
</compile_context>

<pallas_src>
import functools

import jax
import jax.numpy as jnp
from jax import lax
from jax.experimental import pallas as pl
from jax.experimental.pallas import tpu as pltpu

LEAKY_SLOPE = 0.01   # nn.LeakyReLU default
BN_EPS = 1e-5        # nn.BatchNorm1d default
LANE = 128           # TPU lane width


def _round_up(x, m):
    return (x + m - 1) // m * m


# ---------------------------------------------------------------------------
# Pass 1: per-tile matmul + per-tile partial (sum, sum-of-squares) stats
# ---------------------------------------------------------------------------
def _matmul_partial_stats_kernel(x_ref, w_ref, stats_ref, *, n_rows):
    """x_ref: [TN, Cin], w_ref: [Cin, Cpad] -> stats_ref: [2, Cpad] (this tile only)."""
    tn = x_ref.shape[0]
    # MXU matmul, f32 accumulate (bias omitted: cancelled by training-mode BN).
    y = jnp.dot(x_ref[...], w_ref[...], preferred_element_type=jnp.float32)

    if n_rows % tn != 0:
        # Last (partial) tile: zero out contributions from rows past the array
        # end (the padded part of the input block holds unspecified data).
        row = pl.program_id(0) * tn + lax.broadcasted_iota(jnp.int32, (tn, 1), 0)
        y = jnp.where(row < n_rows, y, 0.0)

    # Single full-block store (no accumulation, no masked sub-sublane updates).
    stats_ref[...] = jnp.concatenate(
        [jnp.sum(y, axis=0, keepdims=True),
         jnp.sum(y * y, axis=0, keepdims=True)], axis=0)


# ---------------------------------------------------------------------------
# Pass 2: recompute y = x @ W, then one FMA (folded BN) + LeakyReLU
# ---------------------------------------------------------------------------
def _matmul_bn_lrelu_kernel(x_ref, w_ref, ss_ref, o_ref):
    """x_ref: [TN, Cin], w_ref: [Cin, Cpad], ss_ref: [2, Cpad] -> o_ref: [TN, Cout]."""
    cout = o_ref.shape[1]
    y = jnp.dot(x_ref[...], w_ref[...], preferred_element_type=jnp.float32)
    # scale = gamma*rsqrt(var+eps), shift = beta - mean*scale (precomputed once
    # in the wrapper) -> a single FMA per element here.
    z = y * ss_ref[0:1, :] + ss_ref[1:2, :]
    z = jnp.where(z >= 0, z, LEAKY_SLOPE * z)
    o_ref[...] = z[:, :cout].astype(o_ref.dtype)


# ---------------------------------------------------------------------------
# Wrapper: Linear (bias-free) + BatchNorm1d(training) + LeakyReLU, batch-tiled
# ---------------------------------------------------------------------------
def fused_linear_bn_lrelu(x, w, gamma, beta, *, tile_rows=2048):
    """x: [N, Cin], w: [Cin, Cout], gamma/beta: [Cout] -> [N, Cout] (f32)."""
    n, cin = x.shape
    cout = w.shape[1]
    cpad = _round_up(cout, LANE)   # lane-dense feature dim for the compute

    # Batch tile: multiple of 8 sublanes, capped so there are >= 2 tiles when N
    # permits (keeps both v7x TensorCores busy on the "parallel" grid axes).
    tn = min(_round_up(tile_rows, 8), _round_up(n, 8))
    if n > 8:
        tn = min(tn, _round_up((n + 1) // 2, 8))
    tn = max(tn, 8)
    n_tiles = pl.cdiv(n, tn)

    x = x.astype(jnp.float32)
    # Only the tiny parameter tensors are padded (no full-array pad of x).
    w_p = jnp.pad(w.astype(jnp.float32), ((0, 0), (0, cpad - cout)))

    # ---- Pass 1: matmul + per-tile partial stats (independent -> parallel) ----
    partial_stats = pl.pallas_call(
        functools.partial(_matmul_partial_stats_kernel, n_rows=n),
        out_shape=jax.ShapeDtypeStruct((n_tiles, 2, cpad), jnp.float32),
        grid=(n_tiles,),
        in_specs=[
            pl.BlockSpec((tn, cin), lambda i: (i, 0)),
            pl.BlockSpec((cin, cpad), lambda i: (0, 0)),
        ],
        out_specs=pl.BlockSpec((None, 2, cpad), lambda i: (i, 0, 0)),
        compiler_params=pltpu.CompilerParams(
            dimension_semantics=("parallel",)),
    )(x, w_p)

    # Tiny reduce (n_tiles x 2 x Cpad floats) + BN affine fold, plain XLA.
    stats = jnp.sum(partial_stats, axis=0)          # [2, cpad]
    inv_n = jnp.float32(1.0 / n)
    mean = stats[0] * inv_n
    var = jnp.maximum(stats[1] * inv_n - mean * mean, 0.0)
    g = jnp.pad(gamma.astype(jnp.float32), (0, cpad - cout))
    b = jnp.pad(beta.astype(jnp.float32), (0, cpad - cout))
    scale = g * lax.rsqrt(var + BN_EPS)              # gamma * rsqrt(var+eps)
    shift = b - mean * scale                         # beta  - mean*scale
    scale_shift = jnp.stack([scale, shift])          # [2, cpad]

    # ---- Pass 2: recompute y, folded BN + LeakyReLU, direct [N, Cout] write ----
    out = pl.pallas_call(
        _matmul_bn_lrelu_kernel,
        out_shape=jax.ShapeDtypeStruct((n, cout), jnp.float32),
        grid=(n_tiles,),
        in_specs=[
            pl.BlockSpec((tn, cin), lambda i: (i, 0)),
            pl.BlockSpec((cin, cpad), lambda i: (0, 0)),
            pl.BlockSpec((2, cpad), lambda i: (0, 0)),
        ],
        out_specs=pl.BlockSpec((tn, cout), lambda i: (i, 0)),
        compiler_params=pltpu.CompilerParams(
            dimension_semantics=("parallel",)),
    )(x, w_p, scale_shift)

    return out


class EmbeddingPallas:
    """JAX/Pallas equivalent of the PyTorch `embedding` module (training-mode BN)."""

    def __init__(self, node_input_dim, edge_input_dim, out_dim, key, tile_rows=2048):
        self.tile_rows = tile_rows
        k1, k2, k3, k4 = jax.random.split(key, 4)

        # nn.Linear(node_input_dim, out_dim): weight stored transposed [in, out].
        bound_n = 1.0 / jnp.sqrt(jnp.float32(node_input_dim))
        self.w_node = jax.random.uniform(
            k1, (node_input_dim, out_dim), jnp.float32, -bound_n, bound_n)
        self.b_node = jax.random.uniform(
            k2, (out_dim,), jnp.float32, -bound_n, bound_n)

        # nn.Linear(edge_input_dim, edge_input_dim)
        bound_e = 1.0 / jnp.sqrt(jnp.float32(edge_input_dim))
        self.w_edge = jax.random.uniform(
            k3, (edge_input_dim, edge_input_dim), jnp.float32, -bound_e, bound_e)
        self.b_edge = jax.random.uniform(
            k4, (edge_input_dim,), jnp.float32, -bound_e, bound_e)

        # BatchNorm1d affine params (PyTorch init: gamma=1, beta=0)
        self.gamma_node = jnp.ones((out_dim,), jnp.float32)
        self.beta_node = jnp.zeros((out_dim,), jnp.float32)
        self.gamma_edge = jnp.ones((edge_input_dim,), jnp.float32)
        self.beta_edge = jnp.zeros((edge_input_dim,), jnp.float32)

    def __call__(self, node_feature, edge_feature):
        # Note: the Linear biases (b_node / b_edge) are kept as parameters for
        # parity with PyTorch but are NOT passed to the kernel — training-mode
        # BatchNorm subtracts the batch mean, which cancels them exactly.
        node_out = fused_linear_bn_lrelu(
            node_feature, self.w_node, self.gamma_node, self.beta_node,
            tile_rows=self.tile_rows)
        edge_out = fused_linear_bn_lrelu(
            edge_feature, self.w_edge, self.gamma_edge, self.beta_edge,
            tile_rows=self.tile_rows)
        return node_out, edge_out


def _reference(node_x, edge_x, mod):
    """Pure-JAX reference of the PyTorch forward (training-mode BN, WITH bias)."""
    def branch(x, w, b, g, be):
        y = x @ w + b
        mean = jnp.mean(y, axis=0, keepdims=True)
        var = jnp.mean((y - mean) ** 2, axis=0, keepdims=True)
        z = (y - mean) / jnp.sqrt(var + BN_EPS) * g + be
        return jnp.where(z >= 0, z, LEAKY_SLOPE * z)
    return (branch(node_x, mod.w_node, mod.b_node, mod.gamma_node, mod.beta_node),
            branch(edge_x, mod.w_edge, mod.b_edge, mod.gamma_edge, mod.beta_edge))


if __name__ == "__main__":
    key = jax.random.PRNGKey(0)
    k_node, k_edge, k_params = jax.random.split(key, 3)

    # Small shapes consistent with the module's forward:
    # node_feature: [num_nodes, node_input_dim], edge_feature: [num_edges, edge_input_dim]
    num_nodes, node_input_dim, out_dim = 40, 16, 32
    num_edges, edge_input_dim = 56, 8

    node_feature = jax.random.normal(k_node, (num_nodes, node_input_dim), jnp.float32)
    edge_feature = jax.random.normal(k_edge, (num_edges, edge_input_dim), jnp.float32)

    # tile_rows=16 exercises the multi-tile partial-stats path and the
    # masked / clipped last tile at these small demo sizes; in production the
    # default (2048) is used.
    mod = EmbeddingPallas(node_input_dim, edge_input_dim, out_dim, k_params,
                          tile_rows=16)

    node_out, edge_out = mod(node_feature, edge_feature)
    jax.block_until_ready((node_out, edge_out))

    # Validate against pure-JAX reference (which includes the Linear bias).
    ref_node, ref_edge = _reference(node_feature, edge_feature, mod)
    assert node_out.shape == (num_nodes, out_dim)
    assert edge_out.shape == (num_edges, edge_input_dim)
    assert jnp.allclose(node_out, ref_node, atol=1e-4, rtol=1e-4), \
        float(jnp.max(jnp.abs(node_out - ref_node)))
    assert jnp.allclose(edge_out, ref_edge, atol=1e-4, rtol=1e-4), \
        float(jnp.max(jnp.abs(edge_out - ref_edge)))

    print("KERNEL_OK")
</pallas_src>

<mosaic_0001>
module attributes {stable_mosaic.version = 11 : i64} {
  func.func @_matmul_partial_stats_kernel(%arg0: i32, %arg1: memref<16x16xf32, #tpu.memory_space<vmem>>, %arg2: memref<16x128xf32, #tpu.memory_space<vmem>>, %arg3: memref<1x2x128xf32, #tpu.memory_space<vmem>>) attributes {dimension_semantics = [#tpu.dimension_semantics<parallel>], iteration_bounds = array<i64: 3>, scalar_prefetch = 0 : i64, scratch_operands = 0 : i64, tpu.core_type = #tpu.core_type<tc>, window_params = [{transform_indices = @transform_0, window_bounds = array<i64: 16, 16>}, {pipeline_mode = #tpu.pipeline_mode<synchronous>, transform_indices = @transform_1, window_bounds = array<i64: 16, 128>}, {transform_indices = @transform_2, window_bounds = array<i64: 1, 2, 128>}]} {
    %c0 = arith.constant 0 : index
    %c0_0 = arith.constant 0 : index
    %0 = vector.load %arg1[%c0, %c0_0] : memref<16x16xf32, #tpu.memory_space<vmem>>, vector<16x16xf32>
    %c0_1 = arith.constant 0 : index
    %c0_2 = arith.constant 0 : index
    %1 = vector.load %arg2[%c0_1, %c0_2] : memref<16x128xf32, #tpu.memory_space<vmem>>, vector<16x128xf32>
    %cst = arith.constant dense<0.000000e+00> : vector<16x128xf32>
    %2 = tpu.matmul %0, %1, %cst {dimension_numbers = #tpu.dot_dimension_numbers<[1], [0], [0], [1], [0, 0, 1, 1], [], []>} : vector<16x16xf32>, vector<16x128xf32>, vector<16x128xf32> -> vector<16x128xf32>
    %c16_i32 = arith.constant 16 : i32
    %3 = arith.muli %arg0, %c16_i32 : i32
    %4 = tpu.iota {dimensions = array<i32: 0>} : vector<16x1xi32>
    %5 = vector.broadcast %3 : i32 to vector<16x1xi32>
    %6 = arith.addi %5, %4 : vector<16x1xi32>
    %c40_i32 = arith.constant 40 : i32
    %7 = vector.broadcast %c40_i32 : i32 to vector<16x1xi32>
    %8 = arith.cmpi slt, %6, %7 : vector<16x1xi32>
    %cst_3 = arith.constant 0.000000e+00 : f32
    %9 = vector.shape_cast %8 : vector<16x1xi1> to vector<16x1xi1>
    %10 = vector.broadcast %9 : vector<16x1xi1> to vector<16x128xi1>
    %11 = vector.broadcast %cst_3 : f32 to vector<16x128xf32>
    %12 = arith.select %10, %2, %11 : vector<16x128xi1>, vector<16x128xf32>
    %cst_4 = arith.constant dense<0.000000e+00> : vector<128xf32>
    %13 = vector.multi_reduction <add>, %12, %cst_4 [0] : vector<16x128xf32> to vector<128xf32>
    %14 = vector.shape_cast %13 : vector<128xf32> to vector<1x128xf32>
    %15 = arith.mulf %12, %12 : vector<16x128xf32>
    %cst_5 = arith.constant dense<0.000000e+00> : vector<128xf32>
    %16 = vector.multi_reduction <add>, %15, %cst_5 [0] : vector<16x128xf32> to vector<128xf32>
    %17 = vector.shape_cast %16 : vector<128xf32> to vector<1x128xf32>
    %18 = tpu.concatenate %14, %17 in 0 : vector<1x128xf32>, vector<1x128xf32> -> vector<2x128xf32>
    %c0_6 = arith.constant 0 : index
    %c0_7 = arith.constant 0 : index
    %c0_8 = arith.constant 0 : index
    %19 = vector.load %arg3[%c0_6, %c0_7, %c0_8] : memref<1x2x128xf32, #tpu.memory_space<vmem>>, vector<1x2x128xf32>
    %20 = vector.shape_cast %19 : vector<1x2x128xf32> to vector<2x128xf32>
    %21 = vector.shape_cast %18 : vector<2x128xf32> to vector<1x2x128xf32>
    tpu.vector_store %arg3[%c0_6, %c0_7, %c0_8], %21 {strides = array<i32>} : memref<1x2x128xf32, #tpu.memory_space<vmem>>, vector<1x2x128xf32>,
    return
  }
  func.func @transform_0(%arg0: i32) -> (i32, i32) {
    %c0_i32 = arith.constant 0 : i32
    %c0_i32_0 = arith.constant 0 : i32
    return %arg0, %c0_i32 : i32, i32
  }
  func.func @transform_1(%arg0: i32) -> (i32, i32) {
    %c0_i32 = arith.constant 0 : i32
    %c0_i32_0 = arith.constant 0 : i32
    %c0_i32_1 = arith.constant 0 : i32
    return %c0_i32, %c0_i32_0 : i32, i32
  }
  func.func @transform_2(%arg0: i32) -> (i32, i32, i32) {
    %c0_i32 = arith.constant 0 : i32
    %c0_i32_0 = arith.constant 0 : i32
    %c0_i32_1 = arith.constant 0 : i32
    return %arg0, %c0_i32, %c0_i32_0 : i32, i32, i32
  }
}

</mosaic_0001>

<bundles_post_ra>
// kernel: tpu_custom_call.1
= control target key start
LH: loop header
LB: loop body
LE: loop exit
PB: predicated region body
PF: predicated region fallthrough
CT: control target
= control target key end

     0   :  { %7 = vsyncpa [#allocation3], 0  ;;  %s536_s0 = inlined_call_operand.vmem [shape: f32[40,16], index: 0, kind: input, shape index: {}]   ;;  %s537_s1 = inlined_call_operand.vmem [shape: f32[16,128], index: 1, kind: input, shape index: {}]   ;;  %s538_s2 = inlined_call_operand.hbm [shape: f32[3,2,128], index: 2, kind: output, shape index: {}]  }
   0x1   :  { %9 = vsyncpa [#allocation3 + $0x1], 0  ;;  %s441_s9 = smov 0   ;;  %s443_s10 = smov 0  }
   0x2   :  { %s445_s11 = smov 0   ;;  %s447_s12 = smov 0  }
   0x3 LB: > { %s462_s13 = sadd.s32 4294967295, %s424_s12   ;;  %s307_s14 = sadd.s32 4294967294, %s424_s12   ;;  %s424_s12 = sphi %s447_s12, %s544_s12   ;;  %s420_s11 = sphi %s445_s11, %s543_s11   ;;  %s416_s10 = sphi %s443_s10, %s542_s10   ;;  %s412_s9 = sphi %s441_s9, %s541_s9  }
   0x4   : > { %s466_s15 = sadd.s32 1, %s424_s12   ;;  %s69_s16 = sadd.s32 1, %s420_s11 }
   0x5   : > { %s66_s17 = ssub.s32 %s424_s12, %s466_s15  ;;  %p79_p0 = scmp.ne.s32.totalorder %s420_s11, %s416_s10 }
   0x6   : > { %p67_p1 = scmp.eq.s32.totalorder %s66_s17, 0  ;;  %p80_p2 = scmp.eq.s32.totalorder %s462_s13, 2 }
   0x7   : > { %p85_p3 = scmp.ne.s32.totalorder %s416_s10, %s412_s9  ;;  %p86_p4 = scmp.eq.s32.totalorder %s307_s14, 2 }
   0x8   : > { %s477_s18 = scalar_select %p67_p1, %s420_s11, %s69_s16  }
   0x9   : > { %p479_p5 = por %p80_p2, %p79_p0  ;;  %p483_p6 = por %p86_p4, %p85_p3 }
   0xa   : > { %p310_p7 = scmp.ge.s32.totalorder %s424_s12, 1  ;;  %p124_p8 = scmp.lt.s32.totalorder %s424_s12, 4 }
   0xc   : > { %p125_p9 = pnand %p310_p7, %p124_p8 }
   0xd   : > { %s496_s25 = sshll.u32 (!%p125_p9), %s462_s13, 1  ;;  %s316_s3 = sshll.u32 (!%p125_p9), %s462_s13, 4 }
   0xe   : > { %128 = sbr.rel (%p125_p9) target bundleno = 171 (0xab), region = 28  ;;  %p155_p10 = scmp.lt.s32.totalorder (!%p125_p9), %s496_s25, 4 }
   0xf   : > { %s147_s4 = sand.u32 (!%p125_p9), 1, %s416_s10   ;;  %s243_s8 = scalar_lea.hbm (!%p125_p9), %s538_s2, %s496_s25 }
  0x10   : > { %s311_s5 = sshll.u32 (!%p125_p9), %s147_s4, 1  ;;  %s247_s16 = sshll.u32 (!%p125_p9), %s243_s8, 4  ;;  %s248_s16 = int_to_ptr.hbm [resolvable:$true] %s247_s16 }
  0x11   : > { %s149_s13 = scalar_lea.vmem (!%p125_p9), [#allocation2], %s311_s5  ;;  %s233_s17 = scalar_lea.sflag (!%p125_p9), [#allocation3], %s147_s4 }
  0x12   : > { %s245_s14 = sshll.u32 (!%p125_p9), %s149_s13, 4  ;;  %s376_s21 = sshra.s32 (!%p125_p9), %s248_s16, 4  ;;  %s246_s14 = int_to_ptr.vmem [resolvable:$true] %s245_s14  ;;  %s377_s21 = int_to_ptr.hbm [resolvable:$true] %s376_s21 }
  0x13   : > { %v167_v0 = vld [vmem:[%s537_s1 + $0x8] sm:$0xff]  ;;  %v166_v1 = vld [vmem:[%s537_s1] sm:$0xff]  ;;  %s156_s26 = scalar_select %p155_p10, %s496_s25, 4  ;;  %vm168_vm0 = vcmask 130048   ;;  %v199_v4 = vlaneseq  ;;  %v202_v7 = vstv %s316_s3  ;;  %vm229_vm3 = vcmask 1040384  }
  0x14   : > { %189 = vmatpush.msra.mxu0 %v167_v0  ;;  %321 = vmatpush.msra.mxu1 %v167_v0  ;;  %s378_s22 = scalar_lea.hbm %s377_s21, 2  ;;  %s382_s25 = scalar_lea.hbm %s538_s2, 6 }
  0x15   : > { %s313_s27 = sshll.u32 %s156_s26, 3  ;;  %v200_v5 = vshrl.u32 %v199_v4, 7  ;;  %p379_p11 = scmp.ne.s32.totalorder %s377_s21, %s378_s22 }
  0x16   : > { %190 = vmatpush.msra.mxu0 %v166_v1  ;;  %322 = vmatpush.msra.mxu1 %v166_v1  ;;  %s158_s30 = scalar_lea.vmem %s536_s0, %s313_s27  ;;  %p383_p0 = scmp.lt.s32.totalorder %s377_s21, %s538_s2 }
  0x17   : > { %v164_v2 = vld [vmem:[%s158_s30] sm:$0xff]  ;;  %v165_v3 = vld [vmem:[%s158_s30 + $0x8] sm:$0xff]  ;;  %v201_v6 = vadd.s32 8, %v200_v5  ;;  %v203_v8 = vadd.s32 %v202_v7, %v200_v5  ;;  %p380_p12 = pnand %p379_p11, %p479_p5  ;;  %p384_p1 = scmp.lt.s32.totalorder %s382_s25, %s378_s22 }
  0x18   : > { %314 = vmatmul.msk.f32.vlgmr.msra.gmra.mxu0 %vm168_vm0, %v164_v2  ;;  %315 = vmatmul.msk.f32.vlgmr.msra.gmra.mxu1 %vm168_vm0, %v165_v3 }
  0x19   : > { %v204_v9 = vadd.s32 %v202_v7, %v201_v6  ;;  %vm205_vm1 = vcmp.lt.s32.totalorder %v203_v8, 40  ;;  %p381_p13 = pneg %p380_p12  ;;  %p385_p2 = por %p384_p1, %p383_p0 }
  0x1b   : > { %vm206_vm2 = vcmp.lt.s32.totalorder %v204_v9, 40  ;;  %p386_p3 = pnand %p385_p2, %p381_p13 }
  0x95   : > { %v192_v10 = vpop.f32.mrf.mxu0  ;;  %v195_v11 = vpop.f32.mrf.mxu1 }
  0x96   : > { %v211_v12 = vsel %vm205_vm1, %v192_v10, 0.0  ;;  %v212_v13 = vsel %vm206_vm2, %v195_v11, 0.0 }
  0x97   : > { %v220_v14 = vmul.f32 %v211_v12, %v211_v12  ;;  %v213_v15 = vadd.f32 %v212_v13, %v211_v12  ;;  %v221_v16 = vmul.f32 %v212_v13, %v212_v13 }
  0x99   : > { %v214_v17 = vrot.slane %v213_v15, 4  ;;  %v222_v18 = vadd.f32 %v221_v16, %v220_v14 }
  0x9b   : > { %v215_v19 = vadd.f32 %v214_v17, %v213_v15  ;;  %v223_v20 = vrot.slane %v222_v18, 4 }
  0x9d   : > { %v216_v21 = vrot.slane %v215_v19, 2  ;;  %v224_v22 = vadd.f32 %v223_v20, %v222_v18 }
  0x9f   : > { %v217_v23 = vadd.f32 %v216_v21, %v215_v19  ;;  %v225_v24 = vrot.slane %v224_v22, 2 }
  0xa1   : > { %v218_v25 = vrot.slane %v217_v23, 1  ;;  %v226_v26 = vadd.f32 %v225_v24, %v224_v22 }
  0xa3   : > { %v227_v27 = vrot.slane %v226_v26, 1  ;;  %v219_v28 = vadd.f32 %v218_v25, %v217_v23 }
  0xa5   : > { %v228_v29 = vadd.f32 %v227_v27, %v226_v26 }
  0xa7   : > { %v230_v30 = vsel %vm229_vm3, %v219_v28, %v228_v29 }
  0xa8   : > { %231 = vst [vmem:[%s149_s13] sm:$0x3] %v230_v30 }
  0xa9   : > { %389 = shalt.err (!%p386_p3)
}
  0xaa   : > { %323 = dma.vmem_to_hbm [thread:$0]  (%p479_p5), %s246_s14, 32, %s248_s16, %s233_s17  }
  0xab PF: > { %p329_p4 = scmp.ge.s32.totalorder %s424_s12, 2  ;;  %s259_s28 = sand.u32 1, %s412_s9  }
  0xac   : > { %s260_s29 = scalar_lea.sflag [#allocation3], %s259_s28 }
  0xad   : > { %p326_p7 = pnand %p329_p4, %p483_p6 }
  0xaf   : > { %p327_p8 = pneg %p326_p7 }
  0xb1   : > { %407 = dma.done.wait (%p327_p8), %s260_s29, 32  }
  0xb2   : > { %409 = vsyncadd (%p327_p8), %s260_s29, 4294967264  ;;  %p12_p9 = scmp.ge.s32.totalorder %s466_s15, 5   ;;  %s541_s9 = smov %s416_s10 }
  0xb3   : > { %s542_s10 = smov %s420_s11  ;;  %s543_s11 = smov %s477_s18 }
  0xb4   : > { %s544_s12 = smov %s466_s15  ;;  %14 = sbr.rel (!%p12_p9) target bundleno = 3 (0x3), region = 63 }
  0xb9   :  { %266 = vsyncpa [#allocation3], 1 }
  0xba   :  { %268 = vsyncpa [#allocation3 + $0x1], 1 }

</bundles_post_ra>
